<compile_context>
chip_gen: v7x
topology: tpu7x:2x2x1
jax: 0.10.0
libtpu: 0.0.40
codegen_flags: <defaults>
</compile_context>

<pallas_src>
import functools

import jax
import jax.numpy as jnp
from jax.experimental import pallas as pl
from jax.experimental.pallas import tpu as pltpu


def _matmul_bias_kernel(p_ref, w_ref, b_ref, o_ref, *, mxu_dtype):
    # p_ref : (K, tile_n)   patch slab column tile, K on sublanes, N on lanes
    # w_ref : (Cout, K)     flattened filter (resident across the grid)
    # b_ref : (Cout, 1)     bias column (resident across the grid)
    # o_ref : (Cout, tile_n) lane-dense output tile
    p = p_ref[...]
    w = w_ref[...]
    if mxu_dtype != jnp.float32:
        # bf16 MXU operands (full-rate on v6e/v7x, pass-split f32 avoided on
        # v5e); accumulation stays f32.  No int8 variant: v7x MXU has no int path.
        p = p.astype(mxu_dtype)
        w = w.astype(mxu_dtype)

    # Plain (M,K)x(K,N): contract w's last dim with p's first dim -> (Cout, tile_n).
    out = jax.lax.dot_general(
        w, p,
        dimension_numbers=(((1,), (0,)), ((), ())),
        preferred_element_type=jnp.float32)

    # Bias broadcast over the lane-dense spatial axis, unmasked store.
    o_ref[...] = (out + b_ref[...]).astype(o_ref.dtype)


def conv2d_same(x, weight, bias=None, *, stride=1, groups=1,
                mxu_dtype=jnp.float32, max_col_tile=2048):
    """Conv2dSame forward.

    x:      (B, Cin, H, W)  NCHW float32
    weight: (Cout, Cin, k, k)
    bias:   (Cout,) or None
    """
    if groups != 1:
        # TODO(synk): grouped convolution (groups > 1) is not implemented in the kernel.
        raise NotImplementedError("groups > 1 not supported")

    B, Cin, H, W = x.shape
    Cout, Cin_w, KH, KW = weight.shape
    assert Cin_w == Cin and KH == KW, "square kernel, groups=1 expected"
    k = KH
    ka = k // 2
    kb = ka - 1 if k % 2 == 0 else ka
    assert max(ka, kb) < H and max(ka, kb) < W, (
        "ReflectionPad2d requires pad width < spatial extent "
        f"(pad=({ka},{kb}), spatial=({H},{W}))")

    # ---- wrapper-side glue: reflection pad, NHWC, strided im2col -----------
    # ReflectionPad2d((ka, kb, ka, kb)) == (left, right, top, bottom); jnp
    # 'reflect' matches PyTorch reflection (edge not repeated).
    xp = jnp.pad(x, ((0, 0), (0, 0), (ka, kb), (ka, kb)), mode="reflect")
    xp = jnp.transpose(xp, (0, 2, 3, 1)).astype(jnp.float32)       # (B, Hp, Wp, Cin)

    # PyTorch Conv2d output size on the padded input (ka + kb == k - 1).
    Ho = (H - 1) // stride + 1
    Wo = (W - 1) // stride + 1

    # Stride folded into the gather: only output positions that survive the
    # stride are gathered (no s^2 over-compute thrown away afterwards).
    taps = []
    for kh in range(KH):
        for kw in range(KW):
            win = xp[:,
                     kh: kh + (Ho - 1) * stride + 1: stride,
                     kw: kw + (Wo - 1) * stride + 1: stride,
                     :]                                            # (B, Ho, Wo, Cin)
            taps.append(win)
    # Lane-dense patch slab (KH*KW*Cin, B*Ho*Wo): row order (kh, kw, cin),
    # column order (b, ho, wo).
    patches = jnp.stack(taps, axis=0)                              # (KH*KW, B, Ho, Wo, Cin)
    patches = jnp.transpose(patches, (0, 4, 1, 2, 3))              # (KH*KW, Cin, B, Ho, Wo)
    Kdim = KH * KW * Cin
    N = B * Ho * Wo
    patches = patches.reshape(Kdim, N)

    # Filter flattened to (Cout, KH*KW*Cin) with column order (kh, kw, cin),
    # matching the slab rows.  One-time glue.
    w_mat = jnp.transpose(weight, (0, 2, 3, 1)).reshape(Cout, Kdim).astype(jnp.float32)
    b_col = (bias if bias is not None else jnp.zeros((Cout,), jnp.float32))
    b_col = b_col.reshape(Cout, 1).astype(jnp.float32)

    # ---- column tiling: lane-dense, 128-multiple, "parallel" grid axis -----
    def _round_up(a, m):
        return (a + m - 1) // m * m

    tile_n = min(_round_up(N, 128), max_col_tile)     # multiple of 128
    N_pad = _round_up(N, tile_n)
    if N_pad != N:
        patches = jnp.pad(patches, ((0, 0), (0, N_pad - N)))
    grid = (N_pad // tile_n,)

    # VMEM budget: double-buffered input/output column tiles + resident
    # weight/bias, with headroom.  Kept well under the v7x 32 MiB scoped limit.
    tile_bytes = 4 * (2 * Kdim * tile_n + 2 * Cout * tile_n + Cout * Kdim + Cout)
    vmem_limit = int(min(max(8 * 1024 * 1024, 2 * tile_bytes), 32 * 1024 * 1024))

    kernel = functools.partial(_matmul_bias_kernel, mxu_dtype=mxu_dtype)

    out2d = pl.pallas_call(
        kernel,
        out_shape=jax.ShapeDtypeStruct((Cout, N_pad), jnp.float32),
        grid=grid,
        in_specs=[
            # Patch slab: column tiles, full contraction dim per tile.
            pl.BlockSpec((Kdim, tile_n), lambda i: (0, i),
                         memory_space=pltpu.MemorySpace.VMEM),
            # Weight / bias: constant index_map -> resident, not re-DMA'd per step.
            pl.BlockSpec((Cout, Kdim), lambda i: (0, 0),
                         memory_space=pltpu.MemorySpace.VMEM),
            pl.BlockSpec((Cout, 1), lambda i: (0, 0),
                         memory_space=pltpu.MemorySpace.VMEM),
        ],
        out_specs=pl.BlockSpec((Cout, tile_n), lambda i: (0, i),
                               memory_space=pltpu.MemorySpace.VMEM),
        compiler_params=pltpu.CompilerParams(
            dimension_semantics=("parallel",),
            vmem_limit_bytes=vmem_limit),
    )(patches, w_mat, b_col)

    # Wrapper-side layout restore: drop N padding, (Cout, B*Ho*Wo) -> NCHW.
    out = out2d[:, :N].reshape(Cout, B, Ho, Wo).transpose(1, 0, 2, 3)
    return out.astype(x.dtype)


def _reference(x, weight, bias, *, stride=1):
    """Pure-JAX (XLA conv) reference for Conv2dSame."""
    k = weight.shape[-1]
    ka = k // 2
    kb = ka - 1 if k % 2 == 0 else ka
    xp = jnp.pad(x, ((0, 0), (0, 0), (ka, kb), (ka, kb)), mode="reflect")
    out = jax.lax.conv_general_dilated(
        xp, weight, window_strides=(stride, stride), padding="VALID",
        dimension_numbers=("NCHW", "OIHW", "NCHW"))
    if bias is not None:
        out = out + bias.reshape(1, -1, 1, 1)
    return out


if __name__ == "__main__":
    key = jax.random.PRNGKey(0)
    kx, kw1, kb1, kw2, kb2 = jax.random.split(key, 5)

    B, Cin, H, W = 2, 4, 16, 16
    Cout = 8

    x = jax.random.normal(kx, (B, Cin, H, W), jnp.float32)

    def make_params(kw_key, kb_key, cout, cin, ksz):
        bound = 1.0 / (cin * ksz * ksz) ** 0.5   # torch Conv2d default init range
        w = jax.random.uniform(kw_key, (cout, cin, ksz, ksz), jnp.float32, -bound, bound)
        b = jax.random.uniform(kb_key, (cout,), jnp.float32, -bound, bound)
        return w, b

    # Primary case: k=3, stride=1 (N = 512 = 4*128, lane-dense, grid=(1,)).
    w3, b3 = make_params(kw1, kb1, Cout, Cin, 3)
    out = jax.block_until_ready(conv2d_same(x, w3, b3, stride=1, groups=1))
    ref = _reference(x, w3, b3, stride=1)
    assert out.shape == (B, Cout, H, W)
    assert jnp.allclose(out, ref, atol=1e-4, rtol=1e-4), "mismatch vs reference (k=3, s=1)"

    # Strided case: stride folded into the gather, not post-hoc subsampling.
    out_s2 = jax.block_until_ready(conv2d_same(x, w3, b3, stride=2, groups=1))
    ref_s2 = _reference(x, w3, b3, stride=2)
    assert out_s2.shape == ref_s2.shape
    assert jnp.allclose(out_s2, ref_s2, atol=1e-4, rtol=1e-4), "mismatch vs reference (k=3, s=2)"

    # Even kernel size: asymmetric reflection pad (ka, kb) = (2, 1).
    w4, b4 = make_params(kw2, kb2, Cout, Cin, 4)
    out_k4 = jax.block_until_ready(conv2d_same(x, w4, b4, stride=1, groups=1))
    ref_k4 = _reference(x, w4, b4, stride=1)
    assert out_k4.shape == ref_k4.shape
    assert jnp.allclose(out_k4, ref_k4, atol=1e-4, rtol=1e-4), "mismatch vs reference (k=4, s=1)"

    print("KERNEL_OK")
</pallas_src>

<mosaic_0001>
module attributes {stable_mosaic.version = 11 : i64} {
  func.func @_matmul_bias_kernel(%arg0: i32, %arg1: memref<36x512xf32, #tpu.memory_space<vmem>>, %arg2: memref<8x36xf32, #tpu.memory_space<vmem>>, %arg3: memref<8x1xf32, #tpu.memory_space<vmem>>, %arg4: memref<8x512xf32, #tpu.memory_space<vmem>>) attributes {dimension_semantics = [#tpu.dimension_semantics<parallel>], iteration_bounds = array<i64: 1>, scalar_prefetch = 0 : i64, scratch_operands = 0 : i64, tpu.core_type = #tpu.core_type<tc>, window_params = [{transform_indices = @transform_0, window_bounds = array<i64: 36, 512>}, {pipeline_mode = #tpu.pipeline_mode<synchronous>, transform_indices = @transform_1, window_bounds = array<i64: 8, 36>}, {pipeline_mode = #tpu.pipeline_mode<synchronous>, transform_indices = @transform_2, window_bounds = array<i64: 8, 1>}, {transform_indices = @transform_3, window_bounds = array<i64: 8, 512>}]} {
    %c0 = arith.constant 0 : index
    %c0_0 = arith.constant 0 : index
    %0 = vector.load %arg1[%c0, %c0_0] : memref<36x512xf32, #tpu.memory_space<vmem>>, vector<36x512xf32>
    %c0_1 = arith.constant 0 : index
    %c0_2 = arith.constant 0 : index
    %1 = vector.load %arg2[%c0_1, %c0_2] : memref<8x36xf32, #tpu.memory_space<vmem>>, vector<8x36xf32>
    %cst = arith.constant dense<0.000000e+00> : vector<8x512xf32>
    %2 = tpu.matmul %1, %0, %cst {dimension_numbers = #tpu.dot_dimension_numbers<[1], [0], [0], [1], [0, 0, 1, 1], [], []>} : vector<8x36xf32>, vector<36x512xf32>, vector<8x512xf32> -> vector<8x512xf32>
    %c0_3 = arith.constant 0 : index
    %c0_4 = arith.constant 0 : index
    %3 = vector.load %arg3[%c0_3, %c0_4] : memref<8x1xf32, #tpu.memory_space<vmem>>, vector<8x1xf32>
    %4 = vector.broadcast %3 : vector<8x1xf32> to vector<8x512xf32>
    %5 = arith.addf %2, %4 : vector<8x512xf32>
    %c0_5 = arith.constant 0 : index
    %c0_6 = arith.constant 0 : index
    %6 = vector.load %arg4[%c0_5, %c0_6] : memref<8x512xf32, #tpu.memory_space<vmem>>, vector<8x512xf32>
    tpu.vector_store %arg4[%c0_5, %c0_6], %5 {strides = array<i32>} : memref<8x512xf32, #tpu.memory_space<vmem>>, vector<8x512xf32>,
    return
  }
  func.func @transform_0(%arg0: i32) -> (i32, i32) {
    %c0_i32 = arith.constant 0 : i32
    %c0_i32_0 = arith.constant 0 : i32
    return %c0_i32, %arg0 : i32, i32
  }
  func.func @transform_1(%arg0: i32) -> (i32, i32) {
    %c0_i32 = arith.constant 0 : i32
    %c0_i32_0 = arith.constant 0 : i32
    %c0_i32_1 = arith.constant 0 : i32
    return %c0_i32, %c0_i32_0 : i32, i32
  }
  func.func @transform_2(%arg0: i32) -> (i32, i32) {
    %c0_i32 = arith.constant 0 : i32
    %c0_i32_0 = arith.constant 0 : i32
    %c0_i32_1 = arith.constant 0 : i32
    return %c0_i32, %c0_i32_0 : i32, i32
  }
  func.func @transform_3(%arg0: i32) -> (i32, i32) {
    %c0_i32 = arith.constant 0 : i32
    %c0_i32_0 = arith.constant 0 : i32
    return %c0_i32, %arg0 : i32, i32
  }
}

</mosaic_0001>

<bundles_post_ra>
// kernel: tpu_custom_call.1
= control target key start
LH: loop header
LB: loop body
LE: loop exit
PB: predicated region body
PF: predicated region fallthrough
CT: control target
= control target key end

     0   :  { %8 = vsyncpa [#allocation3], 0  ;;  %s367_s0 = inlined_call_operand.hbm [shape: f32[36,512], index: 0, kind: input, shape index: {}]   ;;  %s368_s1 = inlined_call_operand.vmem [shape: f32[8,36], index: 1, kind: input, shape index: {}]   ;;  %s369_s2 = inlined_call_operand.vmem [shape: f32[8,1], index: 2, kind: input, shape index: {}]   ;;  %s370_s3 = inlined_call_operand.hbm [shape: f32[8,512], index: 3, kind: output, shape index: {}]  }
   0x1   :  { %9 = vsyncpa [#allocation4], 0  ;;  %s311_s12 = smov [#allocation2]   ;;  %s263_s16 = scalar_lea.hbm %s367_s0, 2560 }
   0x2   :  { %s15_s13 = sshll.u32 %s311_s12, 4  ;;  %p264_p0 = scmp.ne.s32.totalorder %s367_s0, %s263_s16  ;;  %s16_s13 = int_to_ptr.vmem [resolvable:$true] %s15_s13 }
   0x3   :  { %p267_p1 = scmp.lt.u32.totalorder %s263_s16, %s367_s0 }
   0x5   :  { %p269_p2 = pnand %p267_p1, %p264_p0 }
   0x7   :  { %272 = shalt.err (!%p269_p2)
}
   0x8   :  { %s273_s21 = scalar_lea.vmem %s16_s13, 2560  ;;  %p278_p4 = scmp.lt.s32.totalorder %s16_s13, %s16_s13 }
   0x9   :  { %p274_p3 = scmp.ne.s32.totalorder %s16_s13, %s273_s21  ;;  %p279_p5 = scmp.lt.s32.totalorder %s273_s21, %s273_s21 }
   0xb   :  { %p280_p6 = por %p279_p5, %p278_p4 }
   0xd   :  { %p281_p7 = pnand %p280_p6, %p274_p3 }
   0xf   :  { %284 = shalt.err (!%p281_p7)
}
  0x10   :  { %s312_s22 = smov 512   ;;  %s313_s23 = smov 32  }
  0x11   :  { %21 = dma.hbm_to_vmem [thread:$0]  %s367_s0, 2560, %s16_s13, [#allocation3], %s312_s22, %s312_s22, %s313_s23  }
  0x12   :  { %307 = dma.done.wait [#allocation3], 2560  }
  0x13   :  { %308 = vsyncadd [#allocation3], 4294964736  ;;  %v314_v0 = vmov 0.0   ;;  %v315_v1 = vmov 0   ;;  %v30_v2 = vld [vmem:[#allocation2 + $0x8] sm:$0xff]  ;;  %v32_v4 = vld [vmem:[#allocation2 + $0x18] sm:$0xff] }
  0x14   :  { %137 = vmatprep.mubr.f32.mxu0 %v314_v0  ;;  %208 = vmatprep.mubr.f32.mxu1 %v314_v0  ;;  %v34_v3 = vld [vmem:[#allocation2 + $0x28] sm:$0xff]  ;;  %v36_v6 = vld [vmem:[#allocation2 + $0x38] sm:$0xff]  ;;  %v29_v7 = vld [vmem:[#allocation2] sm:$0xff]  ;;  %vm60_vm0 = vcmask 1043456   ;;  %vm56_vm1 = vcmask 293888   ;;  %s316_s29 = smov [#allocation5]  }
  0x15   :  { %262 = vset.pattern.permute.xlu0 %v315_v1  ;;  %v240_v5 = vpack.c.bf16 %v34_v3, %v30_v2  ;;  %v33_v8 = vld [vmem:[#allocation2 + $0x20] sm:$0xff]  ;;  %v248_v9 = vpack.c.bf16 %v36_v6, %v32_v4  ;;  %v31_v11 = vld [vmem:[#allocation2 + $0x10] sm:$0xff]  ;;  %v38_v13 = vld [vmem:[#allocation2 + $0x48] sm:$0xff] }
  0x16   :  { %v242_v10 = vpack.c.bf16 %v33_v8, %v29_v7  ;;  %v35_v12 = vld [vmem:[#allocation2 + $0x30] sm:$0xff]  ;;  %v42_v15 = vld [vmem:[#allocation2 + $0x68] sm:$0xff]  ;;  %v40_v16 = vld [vmem:[#allocation2 + $0x58] sm:$0xff] }
  0x17   :  { %241 = vmatprep.subr.bf16.mxu0 %v240_v5  ;;  %v250_v14 = vpack.c.bf16 %v35_v12, %v31_v11  ;;  %v44_v17 = vld [vmem:[#allocation2 + $0x78] sm:$0xff]  ;;  %249 = vmatprep.subr.bf16.mxu1 %v248_v9  ;;  %v244_v18 = vpack.c.bf16 %v42_v15, %v38_v13  ;;  %v37_v20 = vld [vmem:[#allocation2 + $0x40] sm:$0xff]  ;;  %v39_v22 = vld [vmem:[#allocation2 + $0x50] sm:$0xff] }
  0x18   :  { %243 = vmatpush1.bf16.msra.mxu0 %v242_v10  ;;  %v252_v19 = vpack.c.bf16 %v44_v17, %v40_v16  ;;  %v41_v21 = vld [vmem:[#allocation2 + $0x60] sm:$0xff]  ;;  %v43_v24 = vld [vmem:[#allocation2 + $0x70] sm:$0xff]  ;;  %v46_v26 = vld [vmem:[#allocation2 + $0x88] sm:$0xf] }
  0x19   :  { %251 = vmatpush1.bf16.msra.mxu1 %v250_v14  ;;  %v246_v23 = vpack.c.bf16 %v41_v21, %v37_v20  ;;  %245 = vmatprep.subr.bf16.mxu0 %v244_v18  ;;  %v254_v25 = vpack.c.bf16 %v43_v24, %v39_v22  ;;  %v48_v27 = vld [vmem:[#allocation2 + $0x98] sm:$0xf]  ;;  %v50_v28 = vld [vmem:[%s369_s2] sm:$0xff]  ;;  %v47_v30 = vld [vmem:[#allocation2 + $0x90] sm:$0xf]  ;;  %s225_s2 = sshll.u32 %s316_s29, 4  ;;  %s226_s2 = int_to_ptr.vmem [resolvable:$true] %s225_s2 }
  0x1a   :  { %253 = vmatprep.subr.bf16.mxu1 %v252_v19  ;;  %53 = vperm.xlu0 %262, %v50_v28   ;;  %v45_v29 = vld [vmem:[#allocation2 + $0x80] sm:$0xf]  ;;  %p290_p9 = scmp.lt.s32.totalorder %s226_s2, %s226_s2 }
  0x1b   :  { %v49_v31 = vld [vmem:[%s368_s1] sm:$0xff]  ;;  %s285_s1 = scalar_lea.vmem %s226_s2, 512 }
  0x1c   :  { %247 = vmatpush1.bf16.msra.mxu0 %v246_v23  ;;  %p286_p8 = scmp.ne.s32.totalorder %s226_s2, %s285_s1  ;;  %p291_p10 = scmp.lt.s32.totalorder %s285_s1, %s285_s1 }
  0x1d   :  { %255 = vmatpush1.bf16.msra.mxu1 %v254_v25  ;;  %234 = vmatprep.subr.msk.mxu0 %vm60_vm0, %v46_v26 }
  0x1e   :  { %237 = vmatprep.subr.msk.mxu1 %vm60_vm0, %v48_v27  ;;  %p292_p11 = por %p291_p10, %p290_p9 }
  0x20   :  { %235 = vmatpush1.msk.msra.mxu0 %vm60_vm0, %v45_v29  ;;  %p293_p12 = pnand %p292_p11, %p286_p8 }
  0x21   :  { %238 = vmatpush1.msk.msra.mxu1 %vm60_vm0, %v47_v30  ;;  %236 = vmatmul.mubr.msk.f32.vlgmr.msra.gmra.mrb[0].mxu0 %vm56_vm1, %v49_v31 }
  0x22   :  { %239 = vmatmul.mubr.msk.f32.vlgmr.msra.gmra.mrb[0].mxu1 %vm56_vm1, %v49_v31 }
  0x99   :  { %v54_v32 = vpop.permute.xlu0 %53 }
  0xf4   :  { %v139_v33 = vpop.f32.mrb[0].mxu0 }
  0xf5   :  { %v140_v34 = vadd.f32 %v139_v33, %v54_v32  ;;  %v210_v35 = vpop.f32.mrb[0].mxu1  ;;  %v141_v36 = vpop.f32.mrb[1].mxu0 }
  0xf6   :  { %v211_v37 = vadd.f32 %v210_v35, %v54_v32  ;;  %v142_v38 = vadd.f32 %v141_v36, %v54_v32  ;;  %v212_v39 = vpop.f32.mrb[1].mxu1 }
  0xf7   :  { %215 = vst [vmem:[#allocation5] sm:$0xff] %v140_v34  ;;  %v213_v40 = vadd.f32 %v212_v39, %v54_v32 }
  0xf8   :  { %217 = vst [vmem:[#allocation5 + $0x10] sm:$0xff] %v211_v37  ;;  %216 = vst [vmem:[#allocation5 + $0x8] sm:$0xff] %v142_v38 }
  0xf9   :  { %218 = vst [vmem:[#allocation5 + $0x18] sm:$0xff] %v213_v40 }
  0xfa   :  { %296 = shalt.err (!%p293_p12)
}
  0xfb   :  { %s297_s5 = scalar_lea.hbm %s370_s3, 512 }
  0xfc   :  { %p298_p13 = scmp.ne.s32.totalorder %s370_s3, %s297_s5  ;;  %p301_p0 = scmp.lt.u32.totalorder %s297_s5, %s370_s3 }
  0xfe   :  { %p303_p1 = pnand %p301_p0, %p298_p13 }
 0x100   :  { %306 = shalt.err (!%p303_p1)
}
 0x101   :  { %228 = dma.vmem_to_hbm [thread:$0]  %s226_s2, 512, %s370_s3, [#allocation4]  }
 0x102   :  { %309 = dma.done.wait [#allocation4], 512  }
 0x103   :  { %310 = vsyncadd [#allocation4], 4294966784 }
 0x104   :  { %232 = vsyncpa [#allocation3], 1 }
 0x105   :  { %233 = vsyncpa [#allocation4], 1 }

</bundles_post_ra>
